<compile_context>
chip_gen: v7x
topology: tpu7x:2x2x1
jax: 0.10.0
libtpu: 0.0.40
codegen_flags: <defaults>
</compile_context>

<pallas_src>
import jax
import jax.numpy as jnp
from jax.experimental import pallas as pl
from jax.experimental.pallas import tpu as pltpu


def _round_up(n, m):
    return (n + m - 1) // m * m


def _cdiv(a, b):
    return (a + b - 1) // b


def _discriminator_kernel(
    x_ref,            # [TB, 128]               f32 (cast to bf16 in-kernel)
    w1_ref, b1_ref,   # [128, NDF_P]    bf16,   [1, NDF_P]  f32
    w2_ref, b2_ref,   # [NDF_P, NDF_P]  bf16,   [1, NDF_P]  f32
    wh_ref, bh_ref,   # [NDF_P, HEAD_P] bf16 (fused [w3 | w4]), [1, HEAD_P] f32
    out_ref,          # [TB, 1 + np]    f32 raw heads (col 0 = pre-sigmoid logit)
):
    # x arrives as f32 (saves a whole wrapper-side HBM cast pass); the bf16
    # cast is cheap VPU work that hides under the input DMA.
    x = x_ref[...].astype(jnp.bfloat16)

    # main: Linear(128, ndf) -> LeakyReLU(0.2) -> Linear(ndf, ndf) -> LeakyReLU(0.2)
    h = jnp.dot(x, w1_ref[...], preferred_element_type=jnp.float32) + b1_ref[...]
    h = jnp.where(h > 0, h, 0.2 * h)
    h = jnp.dot(h.astype(jnp.bfloat16), w2_ref[...],
                preferred_element_type=jnp.float32) + b2_ref[...]
    h = jnp.where(h > 0, h, 0.2 * h)

    # Fused heads: one 128-lane MXU matmul covers both Linear(ndf, 1) and
    # Linear(ndf, np). Only the 1+np useful columns are written back to HBM
    # (contiguous rows in the output array); sigmoid for column 0 is applied
    # on the tiny [B, 1] slice in the wrapper.
    head = jnp.dot(h.astype(jnp.bfloat16), wh_ref[...],
                   preferred_element_type=jnp.float32) + bh_ref[...]
    out_ref[...] = head[:, : out_ref.shape[-1]].astype(out_ref.dtype)


def prepare_params(params):
    """One-time conversion of torch-convention params ([out, in]) into the
    padded / transposed / bf16 operands the kernel consumes. Call once and
    reuse across forward calls (weights are grid-invariant and tiny)."""
    ndf = params["w1"].shape[0]
    np_out = params["w4"].shape[0]
    ndf_p = _round_up(ndf, 128)           # hidden width padded to full lanes
    head_p = _round_up(1 + np_out, 128)   # fused head matmul width (MXU tile)

    def pad2(a, rows, cols):
        return jnp.pad(a, ((0, rows - a.shape[0]), (0, cols - a.shape[1])))

    return dict(
        w1=pad2(params["w1"].T, 128, ndf_p).astype(jnp.bfloat16),
        b1=pad2(params["b1"].reshape(1, -1), 1, ndf_p).astype(jnp.float32),
        w2=pad2(params["w2"].T, ndf_p, ndf_p).astype(jnp.bfloat16),
        b2=pad2(params["b2"].reshape(1, -1), 1, ndf_p).astype(jnp.float32),
        wh=pad2(jnp.concatenate([params["w3"].T, params["w4"].T], axis=1),
                ndf_p, head_p).astype(jnp.bfloat16),
        bh=pad2(jnp.concatenate([params["b3"], params["b4"]]).reshape(1, -1),
                1, head_p).astype(jnp.float32),
        ndf_p=ndf_p,
        head_p=head_p,
        np_out=np_out,
    )


def discriminator_forward(x, prep, *, tile_b=None):
    """x: [B, 128] float32. prep: output of prepare_params()."""
    B, d_in = x.shape
    assert d_in == 128
    ndf_p, head_p, np_out = prep["ndf_p"], prep["head_p"], prep["np_out"]
    head_dim = 1 + np_out

    # ---- batch tiling ------------------------------------------------------
    B8 = _round_up(B, 8)
    if tile_b is None:
        # <=2048 rows/step keeps per-buffer VMEM ~1 MB while making the
        # ~0.35us/step grid overhead negligible; choose tile_b to divide the
        # (8-aligned) batch so no wrapper-side jnp.pad pass is needed, and
        # prefer >=2 "parallel" steps (both v7x TensorCores) when free.
        n_steps = max(1, _cdiv(B8, 2048))
        if n_steps == 1 and B8 >= 16 and B8 % 16 == 0:
            n_steps = 2
        tile_b = _round_up(_cdiv(B8, n_steps), 8)
    tile_b = max(8, min(_round_up(tile_b, 8), B8))
    n_steps = _cdiv(B8, tile_b)
    b_pad = n_steps * tile_b
    if b_pad != B:
        # Only hit when B is not a multiple of tile_b (rare with the choice above).
        x = jnp.pad(x, ((0, b_pad - B), (0, 0)))

    def const_spec(shape):
        # Invariant operands: constant block index -> DMA'd into VMEM once.
        return pl.BlockSpec(shape, lambda i: (0,) * len(shape))

    out = pl.pallas_call(
        _discriminator_kernel,
        # Narrow (1+np)-wide f32 output: only useful bytes hit HBM (contiguous
        # per tile), instead of a 128-lane padded slab.
        out_shape=jax.ShapeDtypeStruct((b_pad, head_dim), jnp.float32),
        grid_spec=pltpu.PrefetchScalarGridSpec(
            num_scalar_prefetch=0,
            grid=(n_steps,),
            in_specs=[
                pl.BlockSpec((tile_b, 128), lambda i: (i, 0)),        # x tiles (f32)
                const_spec((128, ndf_p)), const_spec((1, ndf_p)),     # w1, b1
                const_spec((ndf_p, ndf_p)), const_spec((1, ndf_p)),   # w2, b2
                const_spec((ndf_p, head_p)), const_spec((1, head_p)), # fused head
            ],
            out_specs=pl.BlockSpec((tile_b, head_dim), lambda i: (i, 0)),
        ),
        compiler_params=pltpu.CompilerParams(
            dimension_semantics=("parallel",),   # batch axis shards across TCs
        ),
    )(x, prep["w1"], prep["b1"], prep["w2"], prep["b2"], prep["wh"], prep["bh"])

    out = out[:B]
    # Sigmoid on the tiny [B, 1] head slice (hoisted out of the kernel; full-tile
    # sigmoid on 128 lanes was 128x wasted EUP work).
    o1 = jax.nn.sigmoid(out[:, 0:1])
    o2 = out[:, 1:1 + np_out]
    return o1, o2


def init_params(key, ndf, np_out):
    """Deterministic parameter init (PyTorch nn.Linear convention: W is [out, in])."""
    ks = jax.random.split(key, 8)

    def lin(kw, kb, fan_in, fan_out):
        bound = 1.0 / jnp.sqrt(fan_in)
        w = jax.random.uniform(kw, (fan_out, fan_in), jnp.float32, -bound, bound)
        b = jax.random.uniform(kb, (fan_out,), jnp.float32, -bound, bound)
        return w, b

    w1, b1 = lin(ks[0], ks[1], 128, ndf)
    w2, b2 = lin(ks[2], ks[3], ndf, ndf)
    w3, b3 = lin(ks[4], ks[5], ndf, 1)
    w4, b4 = lin(ks[6], ks[7], ndf, np_out)
    return dict(w1=w1, b1=b1, w2=w2, b2=b2, w3=w3, b3=b3, w4=w4, b4=b4)


def reference_forward(x, p):
    """Pure-JAX reference mirroring the kernel's bf16 operand quantization."""
    bf = lambda a: a.astype(jnp.bfloat16).astype(jnp.float32)
    leaky = lambda v: jnp.where(v > 0, v, 0.2 * v)
    h = leaky(bf(x) @ bf(p["w1"].T) + p["b1"])
    h = leaky(bf(h) @ bf(p["w2"].T) + p["b2"])
    o1 = jax.nn.sigmoid(bf(h) @ bf(p["w3"].T) + p["b3"])
    o2 = bf(h) @ bf(p["w4"].T) + p["b4"]
    return o1, o2


if __name__ == "__main__":
    key = jax.random.PRNGKey(0)
    k_x, k_p = jax.random.split(key)

    B, ndf, np_out = 8, 64, 8
    x = jax.random.normal(k_x, (B, 128), dtype=jnp.float32)
    params = init_params(k_p, ndf, np_out)

    prep = prepare_params(params)          # one-time weight prep (cached in real use)
    out1, out2 = discriminator_forward(x, prep)
    out1, out2 = jax.block_until_ready((out1, out2))

    ref1, ref2 = reference_forward(x, params)
    assert out1.shape == (B, 1) and out2.shape == (B, np_out)
    assert jnp.allclose(out1, ref1, atol=1e-3, rtol=1e-3)
    assert jnp.allclose(out2, ref2, atol=1e-3, rtol=1e-3)

    print("KERNEL_OK")
</pallas_src>

<mosaic_0001>
module attributes {stable_mosaic.version = 11 : i64} {
  func.func @_discriminator_kernel(%arg0: i32, %arg1: memref<8x128xf32, #tpu.memory_space<vmem>>, %arg2: memref<128x128xbf16, #tpu.memory_space<vmem>>, %arg3: memref<1x128xf32, #tpu.memory_space<vmem>>, %arg4: memref<128x128xbf16, #tpu.memory_space<vmem>>, %arg5: memref<1x128xf32, #tpu.memory_space<vmem>>, %arg6: memref<128x128xbf16, #tpu.memory_space<vmem>>, %arg7: memref<1x128xf32, #tpu.memory_space<vmem>>, %arg8: memref<8x9xf32, #tpu.memory_space<vmem>>) attributes {dimension_semantics = [#tpu.dimension_semantics<parallel>], iteration_bounds = array<i64: 1>, scalar_prefetch = 0 : i64, scratch_operands = 0 : i64, tpu.core_type = #tpu.core_type<tc>, window_params = [{transform_indices = @transform_0, window_bounds = array<i64: 8, 128>}, {pipeline_mode = #tpu.pipeline_mode<synchronous>, transform_indices = @transform_1, window_bounds = array<i64: 128, 128>}, {pipeline_mode = #tpu.pipeline_mode<synchronous>, transform_indices = @transform_2, window_bounds = array<i64: 1, 128>}, {pipeline_mode = #tpu.pipeline_mode<synchronous>, transform_indices = @transform_3, window_bounds = array<i64: 128, 128>}, {pipeline_mode = #tpu.pipeline_mode<synchronous>, transform_indices = @transform_4, window_bounds = array<i64: 1, 128>}, {pipeline_mode = #tpu.pipeline_mode<synchronous>, transform_indices = @transform_5, window_bounds = array<i64: 128, 128>}, {pipeline_mode = #tpu.pipeline_mode<synchronous>, transform_indices = @transform_6, window_bounds = array<i64: 1, 128>}, {transform_indices = @transform_7, window_bounds = array<i64: 8, 9>}]} {
    %c0 = arith.constant 0 : index
    %c0_0 = arith.constant 0 : index
    %0 = vector.load %arg1[%c0, %c0_0] : memref<8x128xf32, #tpu.memory_space<vmem>>, vector<8x128xf32>
    %1 = arith.truncf %0 : vector<8x128xf32> to vector<8x128xbf16>
    %c0_1 = arith.constant 0 : index
    %c0_2 = arith.constant 0 : index
    %2 = vector.load %arg2[%c0_1, %c0_2] : memref<128x128xbf16, #tpu.memory_space<vmem>>, vector<128x128xbf16>
    %cst = arith.constant dense<0.000000e+00> : vector<8x128xf32>
    %3 = tpu.matmul %1, %2, %cst {dimension_numbers = #tpu.dot_dimension_numbers<[1], [0], [0], [1], [0, 0, 1, 1], [], []>} : vector<8x128xbf16>, vector<128x128xbf16>, vector<8x128xf32> -> vector<8x128xf32>
    %c0_3 = arith.constant 0 : index
    %c0_4 = arith.constant 0 : index
    %4 = vector.load %arg3[%c0_3, %c0_4] : memref<1x128xf32, #tpu.memory_space<vmem>>, vector<1x128xf32>
    %5 = vector.broadcast %4 : vector<1x128xf32> to vector<8x128xf32>
    %6 = arith.addf %3, %5 : vector<8x128xf32>
    %cst_5 = arith.constant 0.000000e+00 : f32
    %7 = vector.broadcast %cst_5 : f32 to vector<8x128xf32>
    %8 = arith.cmpf ogt, %6, %7 : vector<8x128xf32>
    %cst_6 = arith.constant 2.000000e-01 : f32
    %9 = vector.broadcast %cst_6 : f32 to vector<8x128xf32>
    %10 = arith.mulf %9, %6 : vector<8x128xf32>
    %11 = arith.select %8, %6, %10 : vector<8x128xi1>, vector<8x128xf32>
    %12 = arith.truncf %11 : vector<8x128xf32> to vector<8x128xbf16>
    %c0_7 = arith.constant 0 : index
    %c0_8 = arith.constant 0 : index
    %13 = vector.load %arg4[%c0_7, %c0_8] : memref<128x128xbf16, #tpu.memory_space<vmem>>, vector<128x128xbf16>
    %cst_9 = arith.constant dense<0.000000e+00> : vector<8x128xf32>
    %14 = tpu.matmul %12, %13, %cst_9 {dimension_numbers = #tpu.dot_dimension_numbers<[1], [0], [0], [1], [0, 0, 1, 1], [], []>} : vector<8x128xbf16>, vector<128x128xbf16>, vector<8x128xf32> -> vector<8x128xf32>
    %c0_10 = arith.constant 0 : index
    %c0_11 = arith.constant 0 : index
    %15 = vector.load %arg5[%c0_10, %c0_11] : memref<1x128xf32, #tpu.memory_space<vmem>>, vector<1x128xf32>
    %16 = vector.broadcast %15 : vector<1x128xf32> to vector<8x128xf32>
    %17 = arith.addf %14, %16 : vector<8x128xf32>
    %cst_12 = arith.constant 0.000000e+00 : f32
    %18 = vector.broadcast %cst_12 : f32 to vector<8x128xf32>
    %19 = arith.cmpf ogt, %17, %18 : vector<8x128xf32>
    %cst_13 = arith.constant 2.000000e-01 : f32
    %20 = vector.broadcast %cst_13 : f32 to vector<8x128xf32>
    %21 = arith.mulf %20, %17 : vector<8x128xf32>
    %22 = arith.select %19, %17, %21 : vector<8x128xi1>, vector<8x128xf32>
    %23 = arith.truncf %22 : vector<8x128xf32> to vector<8x128xbf16>
    %c0_14 = arith.constant 0 : index
    %c0_15 = arith.constant 0 : index
    %24 = vector.load %arg6[%c0_14, %c0_15] : memref<128x128xbf16, #tpu.memory_space<vmem>>, vector<128x128xbf16>
    %cst_16 = arith.constant dense<0.000000e+00> : vector<8x128xf32>
    %25 = tpu.matmul %23, %24, %cst_16 {dimension_numbers = #tpu.dot_dimension_numbers<[1], [0], [0], [1], [0, 0, 1, 1], [], []>} : vector<8x128xbf16>, vector<128x128xbf16>, vector<8x128xf32> -> vector<8x128xf32>
    %c0_17 = arith.constant 0 : index
    %c0_18 = arith.constant 0 : index
    %26 = vector.load %arg7[%c0_17, %c0_18] : memref<1x128xf32, #tpu.memory_space<vmem>>, vector<1x128xf32>
    %27 = vector.broadcast %26 : vector<1x128xf32> to vector<8x128xf32>
    %28 = arith.addf %25, %27 : vector<8x128xf32>
    %29 = vector.extract_strided_slice %28 {offsets = [0, 0], sizes = [8, 9], strides = [1, 1]} : vector<8x128xf32> to vector<8x9xf32>
    %c0_19 = arith.constant 0 : index
    %c0_20 = arith.constant 0 : index
    %30 = vector.load %arg8[%c0_19, %c0_20] : memref<8x9xf32, #tpu.memory_space<vmem>>, vector<8x9xf32>
    tpu.vector_store %arg8[%c0_19, %c0_20], %29 {strides = array<i32>} : memref<8x9xf32, #tpu.memory_space<vmem>>, vector<8x9xf32>,
    return
  }
  func.func @transform_0(%arg0: i32) -> (i32, i32) {
    %c0_i32 = arith.constant 0 : i32
    %c0_i32_0 = arith.constant 0 : i32
    return %arg0, %c0_i32 : i32, i32
  }
  func.func @transform_1(%arg0: i32) -> (i32, i32) {
    %c0_i32 = arith.constant 0 : i32
    %c0_i32_0 = arith.constant 0 : i32
    %c0_i32_1 = arith.constant 0 : i32
    return %c0_i32, %c0_i32_0 : i32, i32
  }
  func.func @transform_2(%arg0: i32) -> (i32, i32) {
    %c0_i32 = arith.constant 0 : i32
    %c0_i32_0 = arith.constant 0 : i32
    %c0_i32_1 = arith.constant 0 : i32
    return %c0_i32, %c0_i32_0 : i32, i32
  }
  func.func @transform_3(%arg0: i32) -> (i32, i32) {
    %c0_i32 = arith.constant 0 : i32
    %c0_i32_0 = arith.constant 0 : i32
    %c0_i32_1 = arith.constant 0 : i32
    return %c0_i32, %c0_i32_0 : i32, i32
  }
  func.func @transform_4(%arg0: i32) -> (i32, i32) {
    %c0_i32 = arith.constant 0 : i32
    %c0_i32_0 = arith.constant 0 : i32
    %c0_i32_1 = arith.constant 0 : i32
    return %c0_i32, %c0_i32_0 : i32, i32
  }
  func.func @transform_5(%arg0: i32) -> (i32, i32) {
    %c0_i32 = arith.constant 0 : i32
    %c0_i32_0 = arith.constant 0 : i32
    %c0_i32_1 = arith.constant 0 : i32
    return %c0_i32, %c0_i32_0 : i32, i32
  }
  func.func @transform_6(%arg0: i32) -> (i32, i32) {
    %c0_i32 = arith.constant 0 : i32
    %c0_i32_0 = arith.constant 0 : i32
    %c0_i32_1 = arith.constant 0 : i32
    return %c0_i32, %c0_i32_0 : i32, i32
  }
  func.func @transform_7(%arg0: i32) -> (i32, i32) {
    %c0_i32 = arith.constant 0 : i32
    %c0_i32_0 = arith.constant 0 : i32
    return %arg0, %c0_i32 : i32, i32
  }
}

</mosaic_0001>

<bundles_post_ra>
// kernel: tpu_custom_call.1
= control target key start
LH: loop header
LB: loop body
LE: loop exit
PB: predicated region body
PF: predicated region fallthrough
CT: control target
= control target key end

     0   :  { %12 = vsyncpa [#allocation3], 0  ;;  %s865_s0 = inlined_call_operand.hbm [shape: f32[8,128], index: 0, kind: input, shape index: {}]   ;;  %s866_s1 = inlined_call_operand.hbm [shape: bf16[128,128], index: 1, kind: input, shape index: {}]   ;;  %s867_s2 = inlined_call_operand.vmem [shape: f32[1,128], index: 2, kind: input, shape index: {}]   ;;  %s868_s3 = inlined_call_operand.hbm [shape: bf16[128,128], index: 3, kind: input, shape index: {}]   ;;  %s869_s4 = inlined_call_operand.vmem [shape: f32[1,128], index: 4, kind: input, shape index: {}]   ;;  %s870_s5 = inlined_call_operand.hbm [shape: bf16[128,128], index: 5, kind: input, shape index: {}]   ;;  %s871_s6 = inlined_call_operand.vmem [shape: f32[1,128], index: 6, kind: input, shape index: {}]   ;;  %s872_s7 = inlined_call_operand.hbm [shape: f32[8,9], index: 7, kind: output, shape index: {}]  }
   0x1   :  { %13 = vsyncpa [#allocation6], 0 }
   0x2   :  { %14 = vsyncpa [#allocation9], 0 }
   0x3   :  { %15 = vsyncpa [#allocation4], 0  ;;  %s708_s24 = smov [#allocation5]   ;;  %s590_s28 = scalar_lea.hbm %s866_s1, 1024 }
   0x4   :  { %s31_s25 = sshll.u32 %s708_s24, 4  ;;  %p591_p0 = scmp.ne.s32.totalorder %s866_s1, %s590_s28  ;;  %s32_s25 = int_to_ptr.vmem [resolvable:$true] %s31_s25 }
   0x5   :  { %p594_p1 = scmp.lt.u32.totalorder %s590_s28, %s866_s1 }
   0x7   :  { %p596_p2 = pnand %p594_p1, %p591_p0 }
   0x9   :  { %599 = shalt.err (!%p596_p2)
}
   0xa   :  { %s600_s10 = scalar_lea.vmem %s32_s25, 1024  ;;  %p605_p4 = scmp.lt.s32.totalorder %s32_s25, %s32_s25 }
   0xb   :  { %p601_p3 = scmp.ne.s32.totalorder %s32_s25, %s600_s10  ;;  %p606_p5 = scmp.lt.s32.totalorder %s600_s10, %s600_s10 }
   0xd   :  { %p607_p6 = por %p606_p5, %p605_p4 }
   0xf   :  { %p608_p7 = pnand %p607_p6, %p601_p3 }
  0x11   :  { %611 = shalt.err (!%p608_p7)
}
  0x12   :  { %s709_s11 = smov 64   ;;  %s710_s12 = smov 4  }
  0x13   :  { %37 = dma.hbm_to_vmem [thread:$0]  %s866_s1, 1024, %s32_s25, [#allocation6], %s709_s11, %s709_s11, %s710_s12  }
  0x14   :  { %s711_s15 = smov [#allocation2]   ;;  %s712_s17 = smov [#allocation7]  }
  0x15   :  { %s22_s16 = sshll.u32 %s711_s15, 4  ;;  %s45_s18 = sshll.u32 %s712_s17, 4  ;;  %s23_s16 = int_to_ptr.vmem [resolvable:$true] %s22_s16  ;;  %s46_s18 = int_to_ptr.vmem [resolvable:$true] %s45_s18 }
  0x16   :  { %s612_s21 = scalar_lea.hbm %s865_s0, 128 }
  0x17   :  { %p613_p8 = scmp.ne.s32.totalorder %s865_s0, %s612_s21  ;;  %p616_p9 = scmp.lt.u32.totalorder %s612_s21, %s865_s0 }
  0x19   :  { %p618_p10 = pnand %p616_p9, %p613_p8 }
  0x1b   :  { %621 = shalt.err (!%p618_p10)
}
  0x1c   :  { %s622_s1 = scalar_lea.vmem %s23_s16, 128  ;;  %p627_p12 = scmp.lt.s32.totalorder %s23_s16, %s23_s16 }
  0x1d   :  { %p623_p11 = scmp.ne.s32.totalorder %s23_s16, %s622_s1  ;;  %p628_p13 = scmp.lt.s32.totalorder %s622_s1, %s622_s1 }
  0x1f   :  { %p629_p0 = por %p628_p13, %p627_p12 }
  0x21   :  { %p630_p1 = pnand %p629_p0, %p623_p11 }
  0x23   :  { %633 = shalt.err (!%p630_p1)
}
  0x24   :  { %25 = dma.hbm_to_vmem [thread:$0]  %s865_s0, 128, %s23_s16, [#allocation3]  }
  0x25   :  { %s634_s30 = scalar_lea.hbm %s868_s3, 1024 }
  0x26   :  { %p635_p2 = scmp.ne.s32.totalorder %s868_s3, %s634_s30  ;;  %p638_p3 = scmp.lt.u32.totalorder %s634_s30, %s868_s3 }
  0x28   :  { %p640_p4 = pnand %p638_p3, %p635_p2 }
  0x2a   :  { %643 = shalt.err (!%p640_p4)
}
  0x2b   :  { %s644_s14 = scalar_lea.vmem %s46_s18, 1024  ;;  %p649_p6 = scmp.lt.s32.totalorder %s46_s18, %s46_s18 }
  0x2c   :  { %p645_p5 = scmp.ne.s32.totalorder %s46_s18, %s644_s14  ;;  %p650_p7 = scmp.lt.s32.totalorder %s644_s14, %s644_s14 }
  0x2e   :  { %p651_p8 = por %p650_p7, %p649_p6 }
  0x30   :  { %p652_p9 = pnand %p651_p8, %p645_p5 }
  0x32   :  { %655 = shalt.err (!%p652_p9)
}
  0x33   :  { %51 = dma.hbm_to_vmem [thread:$0]  %s868_s3, 1024, %s46_s18, [#allocation6], %s709_s11, %s709_s11, %s710_s12  }
  0x34   :  { %s713_s16 = smov [#allocation8]   ;;  %s656_s21 = scalar_lea.hbm %s870_s5, 1024 }
  0x35   :  { %s59_s17 = sshll.u32 %s713_s16, 4  ;;  %p657_p10 = scmp.ne.s32.totalorder %s870_s5, %s656_s21  ;;  %s60_s17 = int_to_ptr.vmem [resolvable:$true] %s59_s17 }
  0x36   :  { %p660_p11 = scmp.lt.u32.totalorder %s656_s21, %s870_s5 }
  0x38   :  { %p662_p12 = pnand %p660_p11, %p657_p10 }
  0x3a   :  { %665 = shalt.err (!%p662_p12)
}
  0x3b   :  { %s666_s1 = scalar_lea.vmem %s60_s17, 1024  ;;  %p671_p0 = scmp.lt.s32.totalorder %s60_s17, %s60_s17 }
  0x3c   :  { %p667_p13 = scmp.ne.s32.totalorder %s60_s17, %s666_s1  ;;  %p672_p1 = scmp.lt.s32.totalorder %s666_s1, %s666_s1 }
  0x3e   :  { %p673_p2 = por %p672_p1, %p671_p0 }
  0x40   :  { %p674_p3 = pnand %p673_p2, %p667_p13 }
  0x42   :  { %677 = shalt.err (!%p674_p3)
}
  0x43   :  { %65 = dma.hbm_to_vmem [thread:$0]  %s870_s5, 1024, %s60_s17, [#allocation9], %s709_s11, %s709_s11, %s710_s12  }
  0x44   :  { %700 = dma.done.wait [#allocation3], 128  }
  0x45   :  { %701 = vsyncadd [#allocation3], 4294967168 }
  0x46   :  { %702 = dma.done.wait [#allocation6], 2048  }
  0x47   :  { %703 = vsyncadd [#allocation6], 4294965248 }
  0x48   :  { %704 = dma.done.wait [#allocation9], 1024  }
  0x49   :  { %705 = vsyncadd [#allocation9], 4294966272  ;;  %v714_v0 = vmov 0.0   ;;  %vm715_vm0 = vmmov 0   ;;  %v566_v1 = vld [vmem:[#allocation5] sm:$0xff]   ;;  %v567_v2 = vld [vmem:[#allocation5 + $0x8] sm:$0xff]  }
  0x4a   :  { %497 = vmatprep.subr.bf16.mxu0 %v714_v0  ;;  %513 = vmatprep.mubr.msk.bf16.mxu0 %vm715_vm0, %v714_v0  ;;  %v568_v3 = vld [vmem:[#allocation5 + $0x10] sm:$0xff]   ;;  %v574_v4 = vld [vmem:[#allocation7] sm:$0xff]   ;;  %v569_v5 = vld [vmem:[#allocation5 + $0x18] sm:$0xff]   ;;  %s716_s28 = smov [#allocation10]   ;;  %vm424_vm3 = vcmask 72704  }
  0x4b   :  { %517 = vmatprep.subr.bf16.mxu1 %v714_v0  ;;  %533 = vmatprep.mubr.msk.bf16.mxu1 %vm715_vm0, %v714_v0  ;;  %v575_v6 = vld [vmem:[#allocation7 + $0x8] sm:$0xff]   ;;  %v570_v7 = vld [vmem:[#allocation5 + $0x20] sm:$0xff]   ;;  %v576_v8 = vld [vmem:[#allocation7 + $0x10] sm:$0xff]   ;;  %s432_s29 = sshll.u32 %s716_s28, 4  ;;  %s433_s29 = int_to_ptr.vmem [resolvable:$true] %s432_s29 }
  0x4c   :  { %498 = vmatpush3.bf16.msra.mxu0 %v566_v1  ;;  %518 = vmatpush3.bf16.msra.mxu1 %v574_v4  ;;  %v571_v9 = vld [vmem:[#allocation5 + $0x28] sm:$0xff]   ;;  %v577_v10 = vld [vmem:[#allocation7 + $0x18] sm:$0xff]   ;;  %v572_v11 = vld [vmem:[#allocation5 + $0x30] sm:$0xff]   ;;  %p683_p5 = scmp.lt.s32.totalorder %s433_s29, %s433_s29 }
  0x4d   :  { %499 = vmatprep.subr.bf16.mxu0 %v714_v0  ;;  %519 = vmatprep.subr.bf16.mxu1 %v714_v0  ;;  %v578_v12 = vld [vmem:[#allocation7 + $0x20] sm:$0xff]   ;;  %v573_v13 = vld [vmem:[#allocation5 + $0x38] sm:$0xff]   ;;  %v579_v15 = vld [vmem:[#allocation7 + $0x28] sm:$0xff]  }
  0x4e   :  { %v81_v14 = vld [vmem:[#allocation2] sm:$0xff]  ;;  %v580_v17 = vld [vmem:[#allocation7 + $0x30] sm:$0xff]   ;;  %v582_v19 = vld [vmem:[#allocation8] sm:$0xff]  }
  0x4f   :  { %v82_v16 = vpack.c.bf16 %v81_v14, %v81_v14  ;;  %v581_v18 = vld [vmem:[#allocation7 + $0x38] sm:$0xff]   ;;  %v583_v20 = vld [vmem:[#allocation8 + $0x8] sm:$0xff]   ;;  %v584_v21 = vld [vmem:[#allocation8 + $0x10] sm:$0xff]  }
  0x50   :  { %500 = vmatpush3.bf16.msra.mxu0 %v567_v2  ;;  %520 = vmatpush3.bf16.msra.mxu1 %v575_v6  ;;  %v585_v22 = vld [vmem:[#allocation8 + $0x18] sm:$0xff]   ;;  %v586_v23 = vld [vmem:[#allocation8 + $0x20] sm:$0xff]   ;;  %v587_v24 = vld [vmem:[#allocation8 + $0x28] sm:$0xff]  }
  0x51   :  { %501 = vmatprep.subr.bf16.mxu0 %v714_v0  ;;  %521 = vmatprep.subr.bf16.mxu1 %v714_v0  ;;  %v443_v25 = vld [vmem:[%s867_s2] ss:$0 sm:$0xff]  ;;  %v588_v34 = vld [vmem:[#allocation8 + $0x30] sm:$0xff]  }
  0x52   :  { %v589_v35 = vld [vmem:[#allocation8 + $0x38] sm:$0xff]  }
  0x53   :  { %v452_v36 = vld [vmem:[%s869_s4] ss:$0 sm:$0xff]  ;;  %s678_s4 = scalar_lea.vmem %s433_s29, 128 }
  0x54   :  { %502 = vmatpush3.bf16.msra.mxu0 %v568_v3  ;;  %522 = vmatpush3.bf16.msra.mxu1 %v576_v8  ;;  %v461_v45 = vld [vmem:[%s871_s6] ss:$0 sm:$0xff]  ;;  %p679_p4 = scmp.ne.s32.totalorder %s433_s29, %s678_s4  ;;  %p684_p6 = scmp.lt.s32.totalorder %s678_s4, %s678_s4 }
  0x55   :  { %503 = vmatprep.subr.bf16.mxu0 %v714_v0  ;;  %523 = vmatprep.subr.bf16.mxu1 %v714_v0 }
  0x56   :  { %p685_p7 = por %p684_p6, %p683_p5 }
  0x58   :  { %504 = vmatpush3.bf16.msra.mxu0 %v569_v5  ;;  %524 = vmatpush3.bf16.msra.mxu1 %v577_v10  ;;  %p686_p8 = pnand %p685_p7, %p679_p4 }
  0x59   :  { %505 = vmatprep.subr.bf16.mxu0 %v714_v0  ;;  %525 = vmatprep.subr.bf16.mxu1 %v714_v0 }
  0x5c   :  { %506 = vmatpush3.bf16.msra.mxu0 %v570_v7  ;;  %526 = vmatpush3.bf16.msra.mxu1 %v578_v12 }
  0x5d   :  { %507 = vmatprep.subr.bf16.mxu0 %v714_v0  ;;  %527 = vmatprep.subr.bf16.mxu1 %v714_v0 }
  0x60   :  { %508 = vmatpush3.bf16.msra.mxu0 %v571_v9  ;;  %528 = vmatpush3.bf16.msra.mxu1 %v579_v15 }
  0x61   :  { %509 = vmatprep.subr.bf16.mxu0 %v714_v0  ;;  %529 = vmatprep.subr.bf16.mxu1 %v714_v0 }
  0x64   :  { %510 = vmatpush3.bf16.msra.mxu0 %v572_v11  ;;  %530 = vmatpush3.bf16.msra.mxu1 %v580_v17 }
  0x65   :  { %511 = vmatprep.subr.bf16.mxu0 %v714_v0  ;;  %531 = vmatprep.subr.bf16.mxu1 %v714_v0 }
  0x68   :  { %512 = vmatpush3.bf16.msra.mxu0 %v573_v13  ;;  %532 = vmatpush3.bf16.msra.mxu1 %v581_v18 }
  0x69   :  { %537 = vmatprep.subr.bf16.mxu0 %v714_v0 }
  0x6b   :  { %514 = vmatmul.mubr.bf16.vlgmr.msra.gmra.mrb[0].mxu0 %v82_v16 }
  0x6c   :  { %553 = vmatprep.mubr.msk.bf16.mxu0 %vm715_vm0, %v714_v0  ;;  %538 = vmatpush3.bf16.msra.mxu0 %v582_v19 }
  0x6d   :  { %539 = vmatprep.subr.bf16.mxu0 %v714_v0 }
  0x70   :  { %540 = vmatpush3.bf16.msra.mxu0 %v583_v20 }
  0x71   :  { %541 = vmatprep.subr.bf16.mxu0 %v714_v0 }
  0x74   :  { %542 = vmatpush3.bf16.msra.mxu0 %v584_v21 }
  0x75   :  { %543 = vmatprep.subr.bf16.mxu0 %v714_v0 }
  0x78   :  { %544 = vmatpush3.bf16.msra.mxu0 %v585_v22 }
  0x79   :  { %545 = vmatprep.subr.bf16.mxu0 %v714_v0 }
  0x7c   :  { %546 = vmatpush3.bf16.msra.mxu0 %v586_v23 }
  0x7d   :  { %547 = vmatprep.subr.bf16.mxu0 %v714_v0 }
  0x80   :  { %548 = vmatpush3.bf16.msra.mxu0 %v587_v24 }
  0x81   :  { %549 = vmatprep.subr.bf16.mxu0 %v714_v0 }
  0x84   :  { %550 = vmatpush3.bf16.msra.mxu0 %v588_v34 }
  0x85   :  { %551 = vmatprep.subr.bf16.mxu0 %v714_v0 }
  0x88   :  { %552 = vmatpush3.bf16.msra.mxu0 %v589_v35 }
 0x13e   :  { %v188_v26 = vpop.f32.mrb[0].mxu0 }
 0x13f   :  { %v189_v27 = vadd.f32 %v443_v25, %v188_v26  ;;  %v515_v28 = vpop.f32.mrb[1].mxu0 }
 0x140   :  { %v191_v29 = vpop.f32.mrb[2].mxu0 }
 0x141   :  { %vm194_vm1 = vcmp.gt.f32.partialorder %v189_v27, 0.0  ;;  %v195_v30 = vmul.f32 0.2, %v189_v27  ;;  %v516_v31 = vpop.f32.mrb[3].mxu0 }
 0x143   :  { %v196_v32 = vsel %vm194_vm1, %v189_v27, %v195_v30 }
 0x144   :  { %v197_v33 = vpack.c.bf16 %v196_v32, %v196_v32 }
 0x146   :  { %534 = vmatmul.mubr.bf16.vlgmr.msra.gmra.mrb[0].mxu1 %v197_v33 }
 0x219   :  { %v303_v37 = vpop.f32.mrb[0].mxu1 }
 0x21a   :  { %v304_v38 = vadd.f32 %v452_v36, %v303_v37  ;;  %v535_v39 = vpop.f32.mrb[1].mxu1 }
 0x21b   :  { %v306_v40 = vpop.f32.mrb[2].mxu1 }
 0x21c   :  { %vm309_vm2 = vcmp.gt.f32.partialorder %v304_v38, 0.0  ;;  %v310_v41 = vmul.f32 0.2, %v304_v38  ;;  %v536_v42 = vpop.f32.mrb[3].mxu1 }
 0x21e   :  { %v311_v43 = vsel %vm309_vm2, %v304_v38, %v310_v41 }
 0x21f   :  { %v312_v44 = vpack.c.bf16 %v311_v43, %v311_v43 }
 0x221   :  { %554 = vmatmul.mubr.bf16.vlgmr.msra.gmra.mrb[4].mxu0 %v312_v44 }
 0x2f4   :  { %v418_v46 = vpop.f32.mrb[4].mxu0 }
 0x2f5   :  { %v419_v47 = vadd.f32 %v461_v45, %v418_v46  ;;  %v555_v48 = vpop.f32.mrb[5].mxu0 }
 0x2f6   :  { %v421_v49 = vpop.f32.mrb[6].mxu0 }
 0x2f7   :  { %v556_v50 = vpop.f32.mrb[7].mxu0  ;;  %425 = vst.msk [vmem:[#allocation10] sm:$0xff] %vm424_vm3, %v419_v47 }
 0x2f8   :  { %689 = shalt.err (!%p686_p8)
}
 0x2f9   :  { %s690_s6 = scalar_lea.hbm %s872_s7, 128 }
 0x2fa   :  { %p691_p9 = scmp.ne.s32.totalorder %s872_s7, %s690_s6  ;;  %p694_p10 = scmp.lt.u32.totalorder %s690_s6, %s872_s7 }
 0x2fc   :  { %p696_p11 = pnand %p694_p10, %p691_p9 }
 0x2fe   :  { %699 = shalt.err (!%p696_p11)
}
 0x2ff   :  { %435 = dma.vmem_to_hbm [thread:$0]  %s433_s29, 128, %s872_s7, [#allocation4]  }
 0x300   :  { %706 = dma.done.wait [#allocation4], 128  }
 0x301   :  { %707 = vsyncadd [#allocation4], 4294967168 }
 0x302   :  { %439 = vsyncpa [#allocation3], 1 }
 0x303   :  { %440 = vsyncpa [#allocation6], 1 }
 0x304   :  { %441 = vsyncpa [#allocation9], 1 }
 0x305   :  { %442 = vsyncpa [#allocation4], 1 }

</bundles_post_ra>
